<compile_context>
chip_gen: v7x
topology: tpu7x:2x2x1
jax: 0.10.0
libtpu: 0.0.40
codegen_flags: <defaults>
</compile_context>

<pallas_src>
import math

import jax
import jax.numpy as jnp
from jax.experimental import pallas as pl
from jax.experimental.pallas import tpu as pltpu


def _round_up(x, m):
    return ((x + m - 1) // m) * m


def _pick_tile(n_pad, t_max, align):
    """Largest multiple of `align` that divides `n_pad` and is <= t_max."""
    best = align
    t = align
    limit = min(t_max, n_pad)
    while t <= limit:
        if n_pad % t == 0:
            best = t
        t += align
    return best


# ---------------------------------------------------------------------------
# Kernel 1: support = X @ W   (row-tiled, weight VMEM-resident)
# ---------------------------------------------------------------------------
def _support_kernel(x_ref, w_ref, o_ref):
    o_ref[...] = jnp.dot(
        x_ref[...], w_ref[...], preferred_element_type=jnp.float32
    ).astype(o_ref.dtype)


# ---------------------------------------------------------------------------
# Kernel 2a: out = adj @ support + bias   (support fully VMEM-resident)
# ---------------------------------------------------------------------------
def _agg_resident_kernel(adj_ref, s_ref, b_ref, o_ref):
    o_ref[...] = (
        jnp.dot(adj_ref[...], s_ref[...], preferred_element_type=jnp.float32)
        + b_ref[...]
    )


# ---------------------------------------------------------------------------
# Kernel 2b: out = adj @ support + bias   (k-tiled, accumulate into o_ref)
# ---------------------------------------------------------------------------
def _agg_tiled_kernel(adj_ref, s_ref, b_ref, o_ref):
    k = pl.program_id(1)

    @pl.when(k == 0)
    def _():
        o_ref[...] = jnp.zeros_like(o_ref)

    o_ref[...] += jnp.dot(
        adj_ref[...], s_ref[...], preferred_element_type=jnp.float32
    )

    @pl.when(k == pl.num_programs(1) - 1)
    def _():
        o_ref[...] += b_ref[...]


def _graph_convolution_impl(x, adj, weight, bias, *, tm=512, tk=1024,
                            use_bf16=False):
    """GCN layer: adj @ (x @ weight) + bias.

    x      : [N, F_in]     float32
    adj    : [N, N]        float32
    weight : [F_in, F_out] float32
    bias   : [F_out]       float32
    returns: [N, F_out]    float32
    """
    n, f_in = x.shape
    f_out = weight.shape[1]
    f32 = jnp.float32
    in_dt = jnp.bfloat16 if use_bf16 else f32
    itemsize = 2 if use_bf16 else 4

    # ---- lane-dense feature padding, minimal (8/128) padding of N ----------
    f_in_p = _round_up(f_in, 128)
    f_out_p = _round_up(f_out, 128)
    n_rows = _round_up(n, 8)      # output rows (sublane granularity)
    n_cols = _round_up(n, 128)    # reduction / adj columns (lane granularity)

    tm = _pick_tile(n_rows, tm, 8)       # output-row tile
    tk = _pick_tile(n_cols, tk, 128)     # reduction tile (fallback path only)
    tr = _pick_tile(n_cols, 1024, 128)   # kernel-1 row tile (decoupled from tk)

    # Zero padding: padded adj columns multiply zero support rows; padded
    # output rows / lanes are sliced off at the end.
    x_p = jnp.pad(x.astype(in_dt), ((0, n_cols - n), (0, f_in_p - f_in)))
    adj_p = jnp.pad(adj.astype(in_dt), ((0, n_rows - n), (0, n_cols - n)))
    w_p = jnp.pad(weight.astype(in_dt),
                  ((0, f_in_p - f_in), (0, f_out_p - f_out)))
    b_p = jnp.pad(bias.astype(f32), (0, f_out_p - f_out)).reshape(1, f_out_p)

    vmem_limit = 40 * 1024 * 1024  # > scoped defaults, headroom on v7x (64MiB)

    # ---- support = X @ W (computed once) ------------------------------------
    support = pl.pallas_call(
        _support_kernel,
        out_shape=jax.ShapeDtypeStruct((n_cols, f_out_p), in_dt),
        grid_spec=pltpu.PrefetchScalarGridSpec(
            num_scalar_prefetch=0,
            grid=(n_cols // tr,),
            in_specs=[
                pl.BlockSpec((tr, f_in_p), lambda i: (i, 0)),        # x rows
                pl.BlockSpec((f_in_p, f_out_p), lambda i: (0, 0)),   # weight
            ],
            out_specs=pl.BlockSpec((tr, f_out_p), lambda i: (i, 0)),
        ),
        compiler_params=pltpu.CompilerParams(
            dimension_semantics=("parallel",),
            vmem_limit_bytes=vmem_limit,
        ),
    )(x_p, w_p)

    # ---- out = adj @ support + bias -----------------------------------------
    support_bytes = n_cols * f_out_p * itemsize
    adj_tile_bytes = tm * n_cols * itemsize
    resident = (support_bytes <= (8 << 20)) and (adj_tile_bytes <= (8 << 20))

    if resident:
        # Support held fully VMEM-resident: one HBM read, one dot per row tile.
        out_p = pl.pallas_call(
            _agg_resident_kernel,
            out_shape=jax.ShapeDtypeStruct((n_rows, f_out_p), f32),
            grid_spec=pltpu.PrefetchScalarGridSpec(
                num_scalar_prefetch=0,
                grid=(n_rows // tm,),
                in_specs=[
                    pl.BlockSpec((tm, n_cols), lambda i: (i, 0)),      # adj
                    pl.BlockSpec((n_cols, f_out_p), lambda i: (0, 0)),  # supp
                    pl.BlockSpec((1, f_out_p), lambda i: (0, 0)),       # bias
                ],
                out_specs=pl.BlockSpec((tm, f_out_p), lambda i: (i, 0)),
            ),
            compiler_params=pltpu.CompilerParams(
                dimension_semantics=("parallel",),
                vmem_limit_bytes=vmem_limit,
            ),
        )(adj_p, support, b_p)
    else:
        # Large-problem fallback: (i, k) grid, accumulate directly into o_ref
        # (output block index constant across k => resident, no scratch).
        out_p = pl.pallas_call(
            _agg_tiled_kernel,
            out_shape=jax.ShapeDtypeStruct((n_rows, f_out_p), f32),
            grid_spec=pltpu.PrefetchScalarGridSpec(
                num_scalar_prefetch=0,
                grid=(n_rows // tm, n_cols // tk),
                in_specs=[
                    pl.BlockSpec((tm, tk), lambda i, k: (i, k)),        # adj
                    pl.BlockSpec((tk, f_out_p), lambda i, k: (k, 0)),   # supp
                    pl.BlockSpec((1, f_out_p), lambda i, k: (0, 0)),    # bias
                ],
                out_specs=pl.BlockSpec((tm, f_out_p), lambda i, k: (i, 0)),
            ),
            compiler_params=pltpu.CompilerParams(
                dimension_semantics=("parallel", "arbitrary"),
                vmem_limit_bytes=vmem_limit,
            ),
        )(adj_p, support, b_p)

    # Slice away the zero padding (rows beyond N, lanes beyond F_out).
    return out_p[:n, :f_out]


# jit so padding / slicing fuse with the pallas_calls (no eager dispatches).
graph_convolution = jax.jit(
    _graph_convolution_impl, static_argnames=("tm", "tk", "use_bf16"))


if __name__ == "__main__":
    # Module hyperparameters (deterministic, in-script init).
    N = 8             # number of graph nodes
    IN_FEATURES = 16
    OUT_FEATURES = 32
    STDV = 1.0 / math.sqrt(OUT_FEATURES)

    key = jax.random.PRNGKey(0)
    k_x, k_adj, k_w, k_b = jax.random.split(key, 4)

    # Parameters: uniform(-stdv, stdv), matching reset_parameters(stdv).
    weight = jax.random.uniform(
        k_w, (IN_FEATURES, OUT_FEATURES), jnp.float32, minval=-STDV, maxval=STDV)
    bias = jax.random.uniform(
        k_b, (OUT_FEATURES,), jnp.float32, minval=-STDV, maxval=STDV)

    # Example inputs.
    x = jax.random.normal(k_x, (N, IN_FEATURES), jnp.float32)
    adj_raw = jax.random.uniform(k_adj, (N, N), jnp.float32)
    adj = adj_raw / jnp.sum(adj_raw, axis=-1, keepdims=True)  # row-normalized

    out = graph_convolution(x, adj, weight, bias)
    out = jax.block_until_ready(out)

    # Reference check in plain JAX (float32).
    ref = adj @ (x @ weight) + bias[None, :]
    assert out.shape == (N, OUT_FEATURES)
    assert jnp.allclose(out, ref, atol=1e-4, rtol=1e-4)

    print("KERNEL_OK")
</pallas_src>

<mosaic_0001>
module attributes {stable_mosaic.version = 11 : i64} {
  func.func @_support_kernel(%arg0: i32, %arg1: memref<128x128xf32, #tpu.memory_space<vmem>>, %arg2: memref<128x128xf32, #tpu.memory_space<vmem>>, %arg3: memref<128x128xf32, #tpu.memory_space<vmem>>) attributes {dimension_semantics = [#tpu.dimension_semantics<parallel>], iteration_bounds = array<i64: 1>, scalar_prefetch = 0 : i64, scratch_operands = 0 : i64, tpu.core_type = #tpu.core_type<tc>, window_params = [{transform_indices = @transform_0, window_bounds = array<i64: 128, 128>}, {pipeline_mode = #tpu.pipeline_mode<synchronous>, transform_indices = @transform_1, window_bounds = array<i64: 128, 128>}, {transform_indices = @transform_2, window_bounds = array<i64: 128, 128>}]} {
    %c0 = arith.constant 0 : index
    %c0_0 = arith.constant 0 : index
    %0 = vector.load %arg1[%c0, %c0_0] : memref<128x128xf32, #tpu.memory_space<vmem>>, vector<128x128xf32>
    %c0_1 = arith.constant 0 : index
    %c0_2 = arith.constant 0 : index
    %1 = vector.load %arg2[%c0_1, %c0_2] : memref<128x128xf32, #tpu.memory_space<vmem>>, vector<128x128xf32>
    %cst = arith.constant dense<0.000000e+00> : vector<128x128xf32>
    %2 = tpu.matmul %0, %1, %cst {dimension_numbers = #tpu.dot_dimension_numbers<[1], [0], [0], [1], [0, 0, 1, 1], [], []>} : vector<128x128xf32>, vector<128x128xf32>, vector<128x128xf32> -> vector<128x128xf32>
    %c0_3 = arith.constant 0 : index
    %c0_4 = arith.constant 0 : index
    %3 = vector.load %arg3[%c0_3, %c0_4] : memref<128x128xf32, #tpu.memory_space<vmem>>, vector<128x128xf32>
    tpu.vector_store %arg3[%c0_3, %c0_4], %2 {strides = array<i32>} : memref<128x128xf32, #tpu.memory_space<vmem>>, vector<128x128xf32>,
    return
  }
  func.func @transform_0(%arg0: i32) -> (i32, i32) {
    %c0_i32 = arith.constant 0 : i32
    %c0_i32_0 = arith.constant 0 : i32
    return %arg0, %c0_i32 : i32, i32
  }
  func.func @transform_1(%arg0: i32) -> (i32, i32) {
    %c0_i32 = arith.constant 0 : i32
    %c0_i32_0 = arith.constant 0 : i32
    %c0_i32_1 = arith.constant 0 : i32
    return %c0_i32, %c0_i32_0 : i32, i32
  }
  func.func @transform_2(%arg0: i32) -> (i32, i32) {
    %c0_i32 = arith.constant 0 : i32
    %c0_i32_0 = arith.constant 0 : i32
    return %arg0, %c0_i32 : i32, i32
  }
}

module attributes {stable_mosaic.version = 11 : i64} {
  func.func @_agg_resident_kernel(%arg0: i32, %arg1: memref<8x128xf32, #tpu.memory_space<vmem>>, %arg2: memref<128x128xf32, #tpu.memory_space<vmem>>, %arg3: memref<1x128xf32, #tpu.memory_space<vmem>>, %arg4: memref<8x128xf32, #tpu.memory_space<vmem>>) attributes {dimension_semantics = [#tpu.dimension_semantics<parallel>], iteration_bounds = array<i64: 1>, scalar_prefetch = 0 : i64, scratch_operands = 0 : i64, tpu.core_type = #tpu.core_type<tc>, window_params = [{transform_indices = @transform_0, window_bounds = array<i64: 8, 128>}, {pipeline_mode = #tpu.pipeline_mode<synchronous>, transform_indices = @transform_1, window_bounds = array<i64: 128, 128>}, {pipeline_mode = #tpu.pipeline_mode<synchronous>, transform_indices = @transform_2, window_bounds = array<i64: 1, 128>}, {transform_indices = @transform_3, window_bounds = array<i64: 8, 128>}]} {
    %c0 = arith.constant 0 : index
    %c0_0 = arith.constant 0 : index
    %0 = vector.load %arg1[%c0, %c0_0] : memref<8x128xf32, #tpu.memory_space<vmem>>, vector<8x128xf32>
    %c0_1 = arith.constant 0 : index
    %c0_2 = arith.constant 0 : index
    %1 = vector.load %arg2[%c0_1, %c0_2] : memref<128x128xf32, #tpu.memory_space<vmem>>, vector<128x128xf32>
    %cst = arith.constant dense<0.000000e+00> : vector<8x128xf32>
    %2 = tpu.matmul %0, %1, %cst {dimension_numbers = #tpu.dot_dimension_numbers<[1], [0], [0], [1], [0, 0, 1, 1], [], []>} : vector<8x128xf32>, vector<128x128xf32>, vector<8x128xf32> -> vector<8x128xf32>
    %c0_3 = arith.constant 0 : index
    %c0_4 = arith.constant 0 : index
    %3 = vector.load %arg3[%c0_3, %c0_4] : memref<1x128xf32, #tpu.memory_space<vmem>>, vector<1x128xf32>
    %4 = vector.broadcast %3 : vector<1x128xf32> to vector<8x128xf32>
    %5 = arith.addf %2, %4 : vector<8x128xf32>
    %c0_5 = arith.constant 0 : index
    %c0_6 = arith.constant 0 : index
    %6 = vector.load %arg4[%c0_5, %c0_6] : memref<8x128xf32, #tpu.memory_space<vmem>>, vector<8x128xf32>
    tpu.vector_store %arg4[%c0_5, %c0_6], %5 {strides = array<i32>} : memref<8x128xf32, #tpu.memory_space<vmem>>, vector<8x128xf32>,
    return
  }
  func.func @transform_0(%arg0: i32) -> (i32, i32) {
    %c0_i32 = arith.constant 0 : i32
    %c0_i32_0 = arith.constant 0 : i32
    return %arg0, %c0_i32 : i32, i32
  }
  func.func @transform_1(%arg0: i32) -> (i32, i32) {
    %c0_i32 = arith.constant 0 : i32
    %c0_i32_0 = arith.constant 0 : i32
    %c0_i32_1 = arith.constant 0 : i32
    return %c0_i32, %c0_i32_0 : i32, i32
  }
  func.func @transform_2(%arg0: i32) -> (i32, i32) {
    %c0_i32 = arith.constant 0 : i32
    %c0_i32_0 = arith.constant 0 : i32
    %c0_i32_1 = arith.constant 0 : i32
    return %c0_i32, %c0_i32_0 : i32, i32
  }
  func.func @transform_3(%arg0: i32) -> (i32, i32) {
    %c0_i32 = arith.constant 0 : i32
    %c0_i32_0 = arith.constant 0 : i32
    return %arg0, %c0_i32 : i32, i32
  }
}

</mosaic_0001>

<bundles_post_ra>
// kernel: _graph_convolution_impl.2
= control target key start
LH: loop header
LB: loop body
LE: loop exit
PB: predicated region body
PF: predicated region fallthrough
CT: control target
= control target key end

     0   :  { %s503_s1 = inlined_call_operand.vmem [shape: f32[128,128], index: 1, kind: input, shape index: {}]   ;;  %s504_s0 = inlined_call_operand.vmem [shape: f32[128,128], index: 0, kind: input, shape index: {}]   ;;  %s505_s2 = inlined_call_operand.vmem [shape: f32[128,128], index: 2, kind: output, shape index: {}]  }
   0x1   :  { %v27_v0 = vld [vmem:[%s503_s1] sm:$0xff]  ;;  %v28_v1 = vld [vmem:[%s503_s1 + $0x8] sm:$0xff]  ;;  %v29_v2 = vld [vmem:[%s503_s1 + $0x10] sm:$0xff] }
   0x2   :  { %v296_v3 = vpack.c.bf16 %v28_v1, %v27_v0  ;;  %v30_v4 = vld [vmem:[%s503_s1 + $0x18] sm:$0xff]  ;;  %v31_v6 = vld [vmem:[%s503_s1 + $0x20] sm:$0xff]  ;;  %v32_v7 = vld [vmem:[%s503_s1 + $0x28] sm:$0xff] }
   0x3   :  { %v300_v5 = vpack.c.bf16 %v30_v4, %v29_v2  ;;  %v304_v8 = vpack.c.bf16 %v32_v7, %v31_v6  ;;  %v11_v9 = vld [vmem:[%s504_s0] sm:$0xff]  ;;  %v33_v11 = vld [vmem:[%s503_s1 + $0x30] sm:$0xff]  ;;  %v34_v12 = vld [vmem:[%s503_s1 + $0x38] sm:$0xff] }
   0x4   :  { %297 = vmatprep.subr.bf16.mxu0 %v296_v3  ;;  %328 = vmatprep.subr.bf16.mxu1 %v296_v3  ;;  %v19_v10 = vld [vmem:[%s504_s0 + $0x40] sm:$0xff]  ;;  %v308_v13 = vpack.c.bf16 %v34_v12, %v33_v11  ;;  %v36_v15 = vld [vmem:[%s503_s1 + $0x48] sm:$0xff]  ;;  %v37_v17 = vld [vmem:[%s503_s1 + $0x50] sm:$0xff] }
   0x5   :  { %299 = vmatpush3.bf16.msra.mxu0 %v296_v3  ;;  %336 = vmatpush3.bf16.msra.mxu1 %v296_v3  ;;  %v35_v14 = vld [vmem:[%s503_s1 + $0x40] sm:$0xff]  ;;  %v38_v18 = vld [vmem:[%s503_s1 + $0x58] sm:$0xff]  ;;  %v40_v21 = vld [vmem:[%s503_s1 + $0x68] sm:$0xff] }
   0x6   :  { %301 = vmatprep.subr.bf16.mxu0 %v300_v5  ;;  %329 = vmatprep.subr.bf16.mxu1 %v300_v5  ;;  %v312_v16 = vpack.c.bf16 %v36_v15, %v35_v14  ;;  %v316_v19 = vpack.c.bf16 %v38_v18, %v37_v17  ;;  %v39_v20 = vld [vmem:[%s503_s1 + $0x60] sm:$0xff]  ;;  %v41_v23 = vld [vmem:[%s503_s1 + $0x70] sm:$0xff]  ;;  %v42_v24 = vld [vmem:[%s503_s1 + $0x78] sm:$0xff] }
   0x7   :  { %272 = vmatprep.mubr.f32.mxu0 %v11_v9  ;;  %284 = vmatprep.mubr.f32.mxu1 %v19_v10  ;;  %v320_v22 = vpack.c.bf16 %v40_v21, %v39_v20  ;;  %v324_v25 = vpack.c.bf16 %v42_v24, %v41_v23  ;;  %v12_v26 = vld [vmem:[%s504_s0 + $0x8] sm:$0xff]  ;;  %v13_v28 = vld [vmem:[%s504_s0 + $0x10] sm:$0xff]  ;;  %v14_v30 = vld [vmem:[%s504_s0 + $0x18] sm:$0xff] }
   0x8   :  { %v20_v27 = vld [vmem:[%s504_s0 + $0x48] sm:$0xff]  ;;  %v21_v29 = vld [vmem:[%s504_s0 + $0x50] sm:$0xff]  ;;  %v22_v31 = vld [vmem:[%s504_s0 + $0x58] sm:$0xff] }
   0x9   :  { %303 = vmatpush3.bf16.msra.mxu0 %v300_v5  ;;  %337 = vmatpush3.bf16.msra.mxu1 %v300_v5  ;;  %v15_v32 = vld [vmem:[%s504_s0 + $0x20] sm:$0xff]  ;;  %v16_v34 = vld [vmem:[%s504_s0 + $0x28] sm:$0xff]  ;;  %v17_v36 = vld [vmem:[%s504_s0 + $0x30] sm:$0xff] }
   0xa   :  { %305 = vmatprep.subr.bf16.mxu0 %v304_v8  ;;  %330 = vmatprep.subr.bf16.mxu1 %v304_v8  ;;  %v23_v33 = vld [vmem:[%s504_s0 + $0x60] sm:$0xff]  ;;  %v24_v35 = vld [vmem:[%s504_s0 + $0x68] sm:$0xff]  ;;  %v25_v37 = vld [vmem:[%s504_s0 + $0x70] sm:$0xff] }
   0xb   :  { %v18_v38 = vld [vmem:[%s504_s0 + $0x38] sm:$0xff] }
   0xc   :  { %v26_v39 = vld [vmem:[%s504_s0 + $0x78] sm:$0xff] }
   0xd   :  { %307 = vmatpush3.bf16.msra.mxu0 %v304_v8  ;;  %338 = vmatpush3.bf16.msra.mxu1 %v304_v8 }
   0xe   :  { %309 = vmatprep.subr.bf16.mxu0 %v308_v13  ;;  %331 = vmatprep.subr.bf16.mxu1 %v308_v13 }
  0x11   :  { %311 = vmatpush3.bf16.msra.mxu0 %v308_v13  ;;  %339 = vmatpush3.bf16.msra.mxu1 %v308_v13 }
  0x12   :  { %313 = vmatprep.subr.bf16.mxu0 %v312_v16  ;;  %332 = vmatprep.subr.bf16.mxu1 %v312_v16 }
  0x15   :  { %315 = vmatpush3.bf16.msra.mxu0 %v312_v16  ;;  %340 = vmatpush3.bf16.msra.mxu1 %v312_v16 }
  0x16   :  { %317 = vmatprep.subr.bf16.mxu0 %v316_v19  ;;  %333 = vmatprep.subr.bf16.mxu1 %v316_v19 }
  0x19   :  { %319 = vmatpush3.bf16.msra.mxu0 %v316_v19  ;;  %341 = vmatpush3.bf16.msra.mxu1 %v316_v19 }
  0x1a   :  { %321 = vmatprep.subr.bf16.mxu0 %v320_v22  ;;  %334 = vmatprep.subr.bf16.mxu1 %v320_v22 }
  0x1d   :  { %323 = vmatpush3.bf16.msra.mxu0 %v320_v22  ;;  %342 = vmatpush3.bf16.msra.mxu1 %v320_v22 }
  0x1e   :  { %325 = vmatprep.subr.bf16.mxu0 %v324_v25  ;;  %335 = vmatprep.subr.bf16.mxu1 %v324_v25 }
  0x21   :  { %327 = vmatpush3.bf16.msra.mxu0 %v324_v25  ;;  %343 = vmatpush3.bf16.msra.mxu1 %v324_v25 }
  0x24   :  { %273 = vmatmul.mubr.f32.vlgmr.msra.gmra.mrb[0].mxu0 %v12_v26  ;;  %285 = vmatmul.mubr.f32.vlgmr.msra.gmra.mrb[0].mxu1 %v20_v27 }
  0x25   :  { %275 = vmatprep.mubr.f32.mxu0 %v13_v28  ;;  %287 = vmatprep.mubr.f32.mxu1 %v21_v29 }
  0x28   :  { %276 = vmatmul.mubr.f32.gmra.mrb[2].mxu0 %v14_v30  ;;  %288 = vmatmul.mubr.f32.gmra.mrb[2].mxu1 %v22_v31 }
  0x29   :  { %278 = vmatprep.mubr.f32.mxu0 %v15_v32  ;;  %290 = vmatprep.mubr.f32.mxu1 %v23_v33 }
  0x2c   :  { %279 = vmatmul.mubr.f32.gmra.mrb[4].mxu0 %v16_v34  ;;  %291 = vmatmul.mubr.f32.gmra.mrb[4].mxu1 %v24_v35 }
  0x2d   :  { %281 = vmatprep.mubr.f32.mxu0 %v17_v36  ;;  %293 = vmatprep.mubr.f32.mxu1 %v25_v37 }
  0x30   :  { %282 = vmatmul.mubr.f32.gmra.mrb[6].mxu0 %v18_v38  ;;  %294 = vmatmul.mubr.f32.gmra.mrb[6].mxu1 %v26_v39 }
  0xf7   :  { %v274_v40 = vpop.f32.mrb[0].mxu0  ;;  %v286_v41 = vpop.f32.mrb[0].mxu1 }
  0xf8   :  { %189 = vst [vmem:[%s505_s2 + $0x8] sm:$0xff] %v274_v40  ;;  %197 = vst [vmem:[%s505_s2 + $0x48] sm:$0xff] %v286_v41  ;;  %v109_v42 = vpop.f32.mrb[1].mxu0  ;;  %v149_v43 = vpop.f32.mrb[1].mxu1 }
  0xf9   :  { %188 = vst [vmem:[%s505_s2] sm:$0xff] %v109_v42  ;;  %196 = vst [vmem:[%s505_s2 + $0x40] sm:$0xff] %v149_v43 }
  0xfb   :  { %v277_v44 = vpop.f32.mrb[2].mxu0  ;;  %v289_v45 = vpop.f32.mrb[2].mxu1 }
  0xfc   :  { %191 = vst [vmem:[%s505_s2 + $0x18] sm:$0xff] %v277_v44  ;;  %199 = vst [vmem:[%s505_s2 + $0x58] sm:$0xff] %v289_v45  ;;  %v119_v46 = vpop.f32.mrb[3].mxu0  ;;  %v159_v47 = vpop.f32.mrb[3].mxu1 }
  0xfd   :  { %190 = vst [vmem:[%s505_s2 + $0x10] sm:$0xff] %v119_v46  ;;  %198 = vst [vmem:[%s505_s2 + $0x50] sm:$0xff] %v159_v47 }
  0xff   :  { %v280_v48 = vpop.f32.mrb[4].mxu0  ;;  %v292_v49 = vpop.f32.mrb[4].mxu1 }
 0x100   :  { %193 = vst [vmem:[%s505_s2 + $0x28] sm:$0xff] %v280_v48  ;;  %201 = vst [vmem:[%s505_s2 + $0x68] sm:$0xff] %v292_v49  ;;  %v129_v50 = vpop.f32.mrb[5].mxu0  ;;  %v169_v51 = vpop.f32.mrb[5].mxu1 }
 0x101   :  { %192 = vst [vmem:[%s505_s2 + $0x20] sm:$0xff] %v129_v50  ;;  %200 = vst [vmem:[%s505_s2 + $0x60] sm:$0xff] %v169_v51 }
 0x103   :  { %v283_v52 = vpop.f32.mrb[6].mxu0  ;;  %v295_v53 = vpop.f32.mrb[6].mxu1 }
 0x104   :  { %195 = vst [vmem:[%s505_s2 + $0x38] sm:$0xff] %v283_v52  ;;  %203 = vst [vmem:[%s505_s2 + $0x78] sm:$0xff] %v295_v53  ;;  %v139_v54 = vpop.f32.mrb[7].mxu0  ;;  %v179_v55 = vpop.f32.mrb[7].mxu1 }
 0x105   :  { %194 = vst [vmem:[%s505_s2 + $0x30] sm:$0xff] %v139_v54  ;;  %202 = vst [vmem:[%s505_s2 + $0x70] sm:$0xff] %v179_v55 }

// kernel: _graph_convolution_impl.3
= control target key start
LH: loop header
LB: loop body
LE: loop exit
PB: predicated region body
PF: predicated region fallthrough
CT: control target
= control target key end

     0   :  { %v229_v3 = vmov 0.0|0.0   ;;  %vm230_vm0 = vmmov 0   ;;  %v231_v6 = vmov 0.0   ;;  %s319_s0 = inlined_call_operand.vmem [shape: f32[8,128], index: 0, kind: input, shape index: {}]   ;;  %s320_s1 = inlined_call_operand.vmem [shape: f32[128,128], index: 1, kind: input, shape index: {}]   ;;  %s321_s2 = inlined_call_operand.vmem [shape: f32[1,128], index: 2, kind: input, shape index: {}]   ;;  %s322_s3 = inlined_call_operand.hbm [shape: f32[8,128], index: 3, kind: output, shape index: {}]  }
   0x1   :  { %v16_v0 = vld [vmem:[%s320_s1] sm:$0xff]  ;;  %v17_v1 = vld [vmem:[%s320_s1 + $0x8] sm:$0xff]  ;;  %v18_v2 = vld [vmem:[%s320_s1 + $0x10] sm:$0xff]  ;;  %177 = vmatprep.subr.bf16.mxu0 %v229_v3  ;;  %174 = vmatprep.mubr.msk.f32.mxu0 %vm230_vm0, %v231_v6 }
   0x2   :  { %v178_v4 = vpack.c.bf16 %v17_v1, %v16_v0  ;;  %v19_v5 = vld [vmem:[%s320_s1 + $0x18] sm:$0xff]  ;;  %v20_v8 = vld [vmem:[%s320_s1 + $0x20] sm:$0xff]  ;;  %v21_v9 = vld [vmem:[%s320_s1 + $0x28] sm:$0xff] }
   0x3   :  { %v181_v7 = vpack.c.bf16 %v19_v5, %v18_v2 }
   0x4   :  { %179 = vmatpush3.bf16.msra.mxu0 %v178_v4 }
   0x5   :  { %180 = vmatprep.subr.bf16.mxu0 %v229_v3 }
   0x6   :  { %8 = vsyncpa [#allocation3], 0  ;;  %v184_v10 = vpack.c.bf16 %v21_v9, %v20_v8  ;;  %v22_v11 = vld [vmem:[%s320_s1 + $0x30] sm:$0xff]  ;;  %v23_v12 = vld [vmem:[%s320_s1 + $0x38] sm:$0xff]  ;;  %s232_s21 = smov [#allocation2]  }
   0x7   :  { %v187_v13 = vpack.c.bf16 %v23_v12, %v22_v11  ;;  %v24_v14 = vld [vmem:[%s320_s1 + $0x40] sm:$0xff]  ;;  %v25_v15 = vld [vmem:[%s320_s1 + $0x48] sm:$0xff]  ;;  %v26_v17 = vld [vmem:[%s320_s1 + $0x50] sm:$0xff]  ;;  %s116_s22 = sshll.u32 %s232_s21, 4  ;;  %s117_s22 = int_to_ptr.vmem [resolvable:$true] %s116_s22 }
   0x8   :  { %182 = vmatpush3.bf16.msra.mxu0 %v181_v7  ;;  %v190_v16 = vpack.c.bf16 %v25_v15, %v24_v14  ;;  %v27_v18 = vld [vmem:[%s320_s1 + $0x58] sm:$0xff]  ;;  %v28_v20 = vld [vmem:[%s320_s1 + $0x60] sm:$0xff]  ;;  %v29_v21 = vld [vmem:[%s320_s1 + $0x68] sm:$0xff]  ;;  %p210_p1 = scmp.lt.s32.totalorder %s117_s22, %s117_s22 }
   0x9   :  { %183 = vmatprep.subr.bf16.mxu0 %v229_v3  ;;  %v193_v19 = vpack.c.bf16 %v27_v18, %v26_v17  ;;  %v196_v22 = vpack.c.bf16 %v29_v21, %v28_v20  ;;  %v30_v23 = vld [vmem:[%s320_s1 + $0x70] sm:$0xff]  ;;  %v31_v24 = vld [vmem:[%s320_s1 + $0x78] sm:$0xff]  ;;  %v15_v26 = vld [vmem:[%s319_s0] sm:$0xff]  ;;  %s205_s1 = scalar_lea.vmem %s117_s22, 128 }
   0xa   :  { %v199_v25 = vpack.c.bf16 %v31_v24, %v30_v23  ;;  %v124_v27 = vld [vmem:[%s321_s2] ss:$0 sm:$0xff]  ;;  %p206_p0 = scmp.ne.s32.totalorder %s117_s22, %s205_s1  ;;  %p211_p2 = scmp.lt.s32.totalorder %s205_s1, %s205_s1 }
   0xc   :  { %185 = vmatpush3.bf16.msra.mxu0 %v184_v10  ;;  %p212_p3 = por %p211_p2, %p210_p1 }
   0xd   :  { %186 = vmatprep.subr.bf16.mxu0 %v229_v3 }
   0xe   :  { %p213_p4 = pnand %p212_p3, %p206_p0 }
  0x10   :  { %188 = vmatpush3.bf16.msra.mxu0 %v187_v13 }
  0x11   :  { %189 = vmatprep.subr.bf16.mxu0 %v229_v3 }
  0x14   :  { %191 = vmatpush3.bf16.msra.mxu0 %v190_v16 }
  0x15   :  { %192 = vmatprep.subr.bf16.mxu0 %v229_v3 }
  0x18   :  { %194 = vmatpush3.bf16.msra.mxu0 %v193_v19 }
  0x19   :  { %195 = vmatprep.subr.bf16.mxu0 %v229_v3 }
  0x1c   :  { %197 = vmatpush3.bf16.msra.mxu0 %v196_v22 }
  0x1d   :  { %198 = vmatprep.subr.bf16.mxu0 %v229_v3 }
  0x20   :  { %200 = vmatpush3.bf16.msra.mxu0 %v199_v25 }
  0x23   :  { %175 = vmatmul.mubr.f32.vlgmr.msra.gmra.mrb[0].mxu0 %v15_v26 }
  0xf6   :  { %v105_v28 = vpop.f32.mrb[0].mxu0 }
  0xf7   :  { %v106_v29 = vadd.f32 %v124_v27, %v105_v28  ;;  %v176_v30 = vpop.f32.mrb[1].mxu0 }
  0xf9   :  { %109 = vst [vmem:[#allocation2] sm:$0xff] %v106_v29 }
  0xfa   :  { %216 = shalt.err (!%p213_p4)
}
  0xfb   :  { %s217_s24 = scalar_lea.hbm %s322_s3, 128 }
  0xfc   :  { %p218_p5 = scmp.ne.s32.totalorder %s322_s3, %s217_s24  ;;  %p221_p6 = scmp.lt.u32.totalorder %s217_s24, %s322_s3 }
  0xfe   :  { %p223_p7 = pnand %p221_p6, %p218_p5 }
 0x100   :  { %226 = shalt.err (!%p223_p7)
}
 0x101   :  { %119 = dma.vmem_to_hbm [thread:$0]  %s117_s22, 128, %s322_s3, [#allocation3]  }
 0x102   :  { %227 = dma.done.wait [#allocation3], 128  }
 0x103   :  { %228 = vsyncadd [#allocation3], 4294967168 }
 0x104   :  { %123 = vsyncpa [#allocation3], 1 }

</bundles_post_ra>
